<compile_context>
chip_gen: v7x
topology: tpu7x:2x2x1
jax: 0.10.0
libtpu: 0.0.40
codegen_flags: <defaults>
</compile_context>

<pallas_src>
import functools

import jax
import jax.numpy as jnp
from jax.experimental import pallas as pl
from jax.experimental.pallas import tpu as pltpu


def _rvq_fused_kernel(x_ref, emb_ref, e2_ref, res_ref, idx_ref, sse_ref, *,
                      n_valid, tile_rows):
    """Fused multi-stage RVQ.  Grid = (row tile i, stage s), stage innermost.

    x_ref:   (TN, D)  f32   flattened (padded) input rows for this tile
    emb_ref: (1, K, D) f32  codebook of stage s
    e2_ref:  (1, 1, K) f32  precomputed ||e||^2 of stage s
    res_ref: (TN, D)  f32   residual accumulator / final output (resident over s)
    idx_ref: (1, num_stages, TN) i32  lane-dense encoding indices (resident over s)
    sse_ref: (1, 1, 1) f32  sum((q - r)^2) accumulated over stages (resident over s)
    """
    i = pl.program_id(0)
    s = pl.program_id(1)

    # First stage for this row tile: residual <- x, SSE <- 0.
    @pl.when(s == 0)
    def _():
        res_ref[...] = x_ref[...]
        sse_ref[...] = jnp.zeros_like(sse_ref)

    r = res_ref[...]                      # (TN, D) current residual
    e = emb_ref[0]                        # (K, D)  codebook for stage s
    e2 = e2_ref[0]                        # (1, K)  ||e||^2
    tn = r.shape[0]
    k = e.shape[0]

    # Distance surrogate: ||e||^2 - 2 r.e^T (r^2 term dropped; same argmin).
    xe = jax.lax.dot_general(r, e, (((1,), (1,)), ((), ())),
                             preferred_element_type=jnp.float32)   # (TN, K) MXU
    d = e2 - 2.0 * xe                                              # (TN, K)

    # argmin along K with first-occurrence tie-breaking (matches torch.argmin).
    d_min = jnp.min(d, axis=1, keepdims=True)                      # (TN, 1)
    lane_iota = jax.lax.broadcasted_iota(jnp.int32, (tn, k), 1)    # (TN, K), hoisted once
    idx = jnp.min(jnp.where(d == d_min, lane_iota, k), axis=1)     # (TN,)

    # Gather codewords via one-hot matmul (MXU-friendly gather, exact values).
    onehot = (idx[:, None] == lane_iota).astype(jnp.float32)       # (TN, K)
    q = jnp.dot(onehot, e, preferred_element_type=jnp.float32)     # (TN, D)

    # Masked SSE (padded rows excluded).  Loss = (1+cc)/(N*D) * total SSE.
    row = jax.lax.broadcasted_iota(jnp.int32, (tn, 1), 0) + i * tile_rows
    valid = (row < n_valid).astype(jnp.float32)                    # (TN, 1)
    diff = (q - r) * valid
    sse_ref[...] = sse_ref[...] + jnp.sum(diff * diff, keepdims=True).reshape(1, 1, 1)

    # Update residual (resident in VMEM; written to HBM once per row tile).
    res_ref[...] = r - q

    # Lane-dense index store: one (1, TN) row per stage.
    idx_ref[0, pl.ds(s, 1), :] = idx[None, :].astype(jnp.int32)


def multi_stage_rvq_forward(x, embeddings, commitment_cost=0.1, tile_rows=512):
    """Forward pass of MultiStageRVQ (all stages fused in one pallas_call).

    x:          (..., D) float input
    embeddings: (num_stages, K, D) float codebooks

    Returns (residual, total_loss, all_indices) matching the PyTorch module:
      residual:    same shape/dtype as x (x minus the sum of all stage quantizations)
      total_loss:  scalar = sum_s (1 + commitment_cost) * mean((q_s - r_s)^2)
      all_indices: list of (N, 1) int32 arrays, one per stage
    """
    num_stages, K, D = embeddings.shape
    orig_shape = x.shape
    orig_dtype = x.dtype
    flat = x.reshape(-1, D).astype(jnp.float32)
    N = flat.shape[0]

    if N <= tile_rows:
        # Single tile: block == full array, so no (8,128) alignment constraint.
        TN = N
        n_tiles = 1
        N_pad = N
        x_pad = flat
    else:
        TN = max(8, (tile_rows // 8) * 8)   # sublane-aligned tile
        N_pad = ((N + TN - 1) // TN) * TN
        n_tiles = N_pad // TN
        x_pad = jnp.pad(flat, ((0, N_pad - N), (0, 0)))

    emb = embeddings.astype(jnp.float32)
    # Hoisted codebook norms: (num_stages, 1, K) so the last two block dims are full.
    e2 = jnp.sum(emb * emb, axis=-1)[:, None, :]

    kernel = functools.partial(_rvq_fused_kernel, n_valid=N, tile_rows=TN)

    # Advisory cost estimate (distance matmul + one-hot gather per stage).
    flops = int(num_stages) * (4 * int(N_pad) * int(K) * int(D))
    bytes_accessed = (int(N_pad) * int(D) * 4 * 2                       # x in + residual out
                      + int(num_stages) * int(K) * (int(D) + 1) * 4     # codebooks + norms
                      + int(num_stages) * int(N_pad) * 4                # indices
                      + int(n_tiles) * 4)                               # per-tile SSE

    res_pad, idx_out, sse_tiles = pl.pallas_call(
        kernel,
        grid=(n_tiles, num_stages),
        in_specs=[
            pl.BlockSpec((TN, D), lambda i, s: (i, 0)),          # x rows (resident over s)
            pl.BlockSpec((1, K, D), lambda i, s: (s, 0, 0)),     # per-stage codebook
            pl.BlockSpec((1, 1, K), lambda i, s: (s, 0, 0)),     # per-stage ||e||^2
        ],
        out_specs=(
            pl.BlockSpec((TN, D), lambda i, s: (i, 0)),                  # residual
            pl.BlockSpec((1, num_stages, TN), lambda i, s: (i, 0, 0)),   # indices (lane-dense)
            pl.BlockSpec((1, 1, 1), lambda i, s: (i, 0, 0)),             # per-tile SSE
        ),
        out_shape=(
            jax.ShapeDtypeStruct((N_pad, D), jnp.float32),
            jax.ShapeDtypeStruct((n_tiles, num_stages, TN), jnp.int32),
            jax.ShapeDtypeStruct((n_tiles, 1, 1), jnp.float32),
        ),
        compiler_params=pltpu.CompilerParams(
            dimension_semantics=("parallel", "arbitrary")),
        cost_estimate=pl.CostEstimate(
            flops=flops, transcendentals=0, bytes_accessed=bytes_accessed),
    )(x_pad, emb, e2)

    residual = res_pad[:N].reshape(orig_shape).astype(orig_dtype)
    total_loss = (1.0 + commitment_cost) / (N * D) * jnp.sum(sse_tiles)
    # (n_tiles, num_stages, TN) -> (num_stages, N) -> list of (N, 1)
    idx_flat = jnp.transpose(idx_out, (1, 0, 2)).reshape(num_stages, N_pad)[:, :N]
    all_indices = [idx_flat[s][:, None] for s in range(num_stages)]
    return residual, total_loss, all_indices


def _reference_forward(x, embeddings, commitment_cost=0.1):
    """Pure-JAX reference mirroring the PyTorch module, for verification."""
    num_stages, K, D = embeddings.shape
    residual = x.reshape(-1, D).astype(jnp.float32)
    total_loss = 0.0
    all_indices = []
    for s in range(num_stages):
        e = embeddings[s]
        d = (jnp.sum(residual ** 2, axis=1, keepdims=True)
             + jnp.sum(e ** 2, axis=1)
             - 2.0 * residual @ e.T)
        idx = jnp.argmin(d, axis=1)
        q = e[idx]
        mse = jnp.mean((q - residual) ** 2)
        total_loss = total_loss + (1.0 + commitment_cost) * mse
        residual = residual - q
        all_indices.append(idx[:, None].astype(jnp.int32))
    return residual.reshape(x.shape), total_loss, all_indices


def _check(x, embeddings, commitment_cost, tile_rows):
    residual, total_loss, all_indices = multi_stage_rvq_forward(
        x, embeddings, commitment_cost, tile_rows=tile_rows)
    jax.block_until_ready(residual)
    jax.block_until_ready(total_loss)
    for idx in all_indices:
        jax.block_until_ready(idx)

    ref_res, ref_loss, ref_idx = _reference_forward(x, embeddings, commitment_cost)
    N = x.reshape(-1, x.shape[-1]).shape[0]
    assert residual.shape == x.shape
    assert jnp.allclose(residual, ref_res, atol=1e-5), "residual mismatch"
    assert jnp.allclose(total_loss, ref_loss, atol=1e-5), "loss mismatch"
    for a, b in zip(all_indices, ref_idx):
        assert a.shape == (N, 1)
        assert jnp.array_equal(a, b), "indices mismatch"


if __name__ == "__main__":
    num_stages = 3
    num_embeddings = 16      # K
    embedding_dim = 32       # D
    commitment_cost = 0.1
    batch, seq = 2, 8        # x is any (..., D); here (2, 8, 32) -> N = 16

    key = jax.random.PRNGKey(0)
    kx, ke, kx2 = jax.random.split(key, 3)

    x = jax.random.normal(kx, (batch, seq, embedding_dim), dtype=jnp.float32)
    # nn.Embedding init: uniform(-1/K, 1/K), one codebook per stage.
    embeddings = jax.random.uniform(
        ke, (num_stages, num_embeddings, embedding_dim),
        minval=-1.0 / num_embeddings, maxval=1.0 / num_embeddings,
        dtype=jnp.float32)

    # Test 1: single-tile path (N <= tile_rows).
    _check(x, embeddings, commitment_cost, tile_rows=512)

    # Test 2: multi-tile path with row padding + SSE masking (N = 15, TN = 8).
    x2 = jax.random.normal(kx2, (3, 5, embedding_dim), dtype=jnp.float32)
    _check(x2, embeddings, commitment_cost, tile_rows=8)

    print("KERNEL_OK")
</pallas_src>

<mosaic_0001>
module attributes {stable_mosaic.version = 11 : i64} {
  func.func @_rvq_fused_kernel(%arg0: i32, %arg1: i32, %arg2: memref<16x32xf32, #tpu.memory_space<vmem>>, %arg3: memref<1x16x32xf32, #tpu.memory_space<vmem>>, %arg4: memref<1x1x16xf32, #tpu.memory_space<vmem>>, %arg5: memref<16x32xf32, #tpu.memory_space<vmem>>, %arg6: memref<1x3x16xi32, #tpu.memory_space<vmem>>, %arg7: memref<1x1x1xf32, #tpu.memory_space<vmem>>) attributes {dimension_semantics = [#tpu.dimension_semantics<parallel>, #tpu.dimension_semantics<arbitrary>], iteration_bounds = array<i64: 1, 3>, scalar_prefetch = 0 : i64, scratch_operands = 0 : i64, tpu.core_type = #tpu.core_type<tc>, window_params = [{transform_indices = @transform_0, window_bounds = array<i64: 16, 32>}, {transform_indices = @transform_1, window_bounds = array<i64: 1, 16, 32>}, {transform_indices = @transform_2, window_bounds = array<i64: 1, 1, 16>}, {transform_indices = @transform_3, window_bounds = array<i64: 16, 32>}, {transform_indices = @transform_4, window_bounds = array<i64: 1, 3, 16>}, {transform_indices = @transform_5, window_bounds = array<i64: 1, 1, 1>}]} {
    %c0_i32 = arith.constant 0 : i32
    %0 = arith.cmpi eq, %arg1, %c0_i32 : i32
    %1 = arith.extui %0 : i1 to i32
    %c0_i32_0 = arith.constant 0 : i32
    %2 = arith.cmpi ne, %1, %c0_i32_0 : i32
    scf.if %2 {
      %c0_25 = arith.constant 0 : index
      %c0_26 = arith.constant 0 : index
      %55 = vector.load %arg2[%c0_25, %c0_26] : memref<16x32xf32, #tpu.memory_space<vmem>>, vector<16x32xf32>
      %c0_27 = arith.constant 0 : index
      %c0_28 = arith.constant 0 : index
      %56 = vector.load %arg5[%c0_27, %c0_28] : memref<16x32xf32, #tpu.memory_space<vmem>>, vector<16x32xf32>
      tpu.vector_store %arg5[%c0_27, %c0_28], %55 {strides = array<i32>} : memref<16x32xf32, #tpu.memory_space<vmem>>, vector<16x32xf32>,
      %cst_29 = arith.constant 0.000000e+00 : f32
      %57 = vector.broadcast %cst_29 : f32 to vector<1x1x1xf32>
      %c0_30 = arith.constant 0 : index
      %c0_31 = arith.constant 0 : index
      %c0_32 = arith.constant 0 : index
      %58 = vector.load %arg7[%c0_30, %c0_31, %c0_32] : memref<1x1x1xf32, #tpu.memory_space<vmem>>, vector<1x1x1xf32>
      tpu.vector_store %arg7[%c0_30, %c0_31, %c0_32], %57 {strides = array<i32>} : memref<1x1x1xf32, #tpu.memory_space<vmem>>, vector<1x1x1xf32>,
    } else {
    }
    %c0 = arith.constant 0 : index
    %c0_1 = arith.constant 0 : index
    %3 = vector.load %arg5[%c0, %c0_1] : memref<16x32xf32, #tpu.memory_space<vmem>>, vector<16x32xf32>
    %c0_2 = arith.constant 0 : index
    %c0_3 = arith.constant 0 : index
    %c0_4 = arith.constant 0 : index
    %4 = vector.load %arg3[%c0_2, %c0_3, %c0_4] : memref<1x16x32xf32, #tpu.memory_space<vmem>>, vector<1x16x32xf32>
    %5 = vector.shape_cast %4 : vector<1x16x32xf32> to vector<16x32xf32>
    %c0_5 = arith.constant 0 : index
    %c0_6 = arith.constant 0 : index
    %c0_7 = arith.constant 0 : index
    %6 = vector.load %arg4[%c0_5, %c0_6, %c0_7] : memref<1x1x16xf32, #tpu.memory_space<vmem>>, vector<1x1x16xf32>
    %7 = vector.shape_cast %6 : vector<1x1x16xf32> to vector<1x16xf32>
    %cst = arith.constant dense<0.000000e+00> : vector<16x16xf32>
    %8 = tpu.matmul %3, %5, %cst {dimension_numbers = #tpu.dot_dimension_numbers<[1], [1], [0], [0], [0, 0, 1, 0], [], []>} : vector<16x32xf32>, vector<16x32xf32>, vector<16x16xf32> -> vector<16x16xf32>
    %cst_8 = arith.constant 2.000000e+00 : f32
    %9 = vector.broadcast %cst_8 : f32 to vector<16x16xf32>
    %10 = arith.mulf %9, %8 : vector<16x16xf32>
    %11 = vector.broadcast %7 : vector<1x16xf32> to vector<16x16xf32>
    %12 = arith.subf %11, %10 : vector<16x16xf32>
    %cst_9 = arith.constant dense<0x7F800000> : vector<16xf32>
    %13 = vector.multi_reduction <minimumf>, %12, %cst_9 [1] : vector<16x16xf32> to vector<16xf32>
    %14 = vector.shape_cast %13 : vector<16xf32> to vector<16x1xf32>
    %15 = tpu.iota {dimensions = array<i32: 1>} : vector<16x16xi32>
    %16 = vector.broadcast %14 : vector<16x1xf32> to vector<16x16xf32>
    %17 = arith.cmpf oeq, %12, %16 : vector<16x16xf32>
    %c16_i32 = arith.constant 16 : i32
    %18 = vector.broadcast %c16_i32 : i32 to vector<16x16xi32>
    %19 = arith.select %17, %15, %18 : vector<16x16xi1>, vector<16x16xi32>
    %cst_10 = arith.constant dense<2147483647> : vector<16xi32>
    %20 = vector.multi_reduction <minsi>, %19, %cst_10 [1] : vector<16x16xi32> to vector<16xi32>
    %21 = vector.shape_cast %20 : vector<16xi32> to vector<16x1xi32>
    %22 = vector.broadcast %21 : vector<16x1xi32> to vector<16x16xi32>
    %23 = arith.cmpi eq, %22, %15 : vector<16x16xi32>
    %24 = arith.extui %23 : vector<16x16xi1> to vector<16x16xi32>
    %25 = arith.sitofp %24 : vector<16x16xi32> to vector<16x16xf32>
    %cst_11 = arith.constant dense<0.000000e+00> : vector<16x32xf32>
    %26 = tpu.matmul %25, %5, %cst_11 {dimension_numbers = #tpu.dot_dimension_numbers<[1], [0], [0], [1], [0, 0, 1, 1], [], []>} : vector<16x16xf32>, vector<16x32xf32>, vector<16x32xf32> -> vector<16x32xf32>
    %27 = tpu.iota {dimensions = array<i32: 0>} : vector<16x1xi32>
    %c16_i32_12 = arith.constant 16 : i32
    %28 = arith.muli %arg0, %c16_i32_12 : i32
    %29 = vector.broadcast %28 : i32 to vector<16x1xi32>
    %30 = arith.addi %27, %29 : vector<16x1xi32>
    %c16_i32_13 = arith.constant 16 : i32
    %31 = vector.broadcast %c16_i32_13 : i32 to vector<16x1xi32>
    %32 = arith.cmpi slt, %30, %31 : vector<16x1xi32>
    %33 = arith.extui %32 : vector<16x1xi1> to vector<16x1xi32>
    %34 = arith.sitofp %33 : vector<16x1xi32> to vector<16x1xf32>
    %35 = arith.subf %26, %3 : vector<16x32xf32>
    %36 = vector.broadcast %34 : vector<16x1xf32> to vector<16x32xf32>
    %37 = arith.mulf %35, %36 : vector<16x32xf32>
    %c0_14 = arith.constant 0 : index
    %c0_15 = arith.constant 0 : index
    %c0_16 = arith.constant 0 : index
    %38 = vector.load %arg7[%c0_14, %c0_15, %c0_16] : memref<1x1x1xf32, #tpu.memory_space<vmem>>, vector<1x1x1xf32>
    %39 = arith.mulf %37, %37 : vector<16x32xf32>
    %40 = vector.shape_cast %39 : vector<16x32xf32> to vector<1x16x32xf32>
    %cst_17 = arith.constant dense<0.000000e+00> : vector<1xf32>
    %41 = vector.multi_reduction <add>, %40, %cst_17 [1, 2] : vector<1x16x32xf32> to vector<1xf32>
    %42 = vector.shape_cast %41 : vector<1xf32> to vector<1x1x1xf32>
    %43 = vector.extract %42[0, 0, 0] : f32 from vector<1x1x1xf32>
    %44 = vector.broadcast %43 : f32 to vector<1x1xf32>
    %45 = vector.shape_cast %44 : vector<1x1xf32> to vector<1x1x1xf32>
    %46 = arith.addf %38, %45 : vector<1x1x1xf32>
    %c0_18 = arith.constant 0 : index
    %c0_19 = arith.constant 0 : index
    %c0_20 = arith.constant 0 : index
    %47 = vector.load %arg7[%c0_18, %c0_19, %c0_20] : memref<1x1x1xf32, #tpu.memory_space<vmem>>, vector<1x1x1xf32>
    tpu.vector_store %arg7[%c0_18, %c0_19, %c0_20], %46 {strides = array<i32>} : memref<1x1x1xf32, #tpu.memory_space<vmem>>, vector<1x1x1xf32>,
    %48 = arith.subf %3, %26 : vector<16x32xf32>
    %c0_21 = arith.constant 0 : index
    %c0_22 = arith.constant 0 : index
    %49 = vector.load %arg5[%c0_21, %c0_22] : memref<16x32xf32, #tpu.memory_space<vmem>>, vector<16x32xf32>
    tpu.vector_store %arg5[%c0_21, %c0_22], %48 {strides = array<i32>} : memref<16x32xf32, #tpu.memory_space<vmem>>, vector<16x32xf32>,
    %50 = vector.shape_cast %20 : vector<16xi32> to vector<1x16xi32>
    %c0_23 = arith.constant 0 : index
    %51 = arith.index_cast %arg1 : i32 to index
    %c0_24 = arith.constant 0 : index
    %52 = vector.load %arg6[%c0_23, %51, %c0_24] : memref<1x3x16xi32, #tpu.memory_space<vmem>>, vector<1x1x16xi32>
    %53 = vector.shape_cast %52 : vector<1x1x16xi32> to vector<1x16xi32>
    %54 = vector.shape_cast %50 : vector<1x16xi32> to vector<1x1x16xi32>
    tpu.vector_store %arg6[%c0_23, %51, %c0_24], %54 {strides = array<i32>} : memref<1x3x16xi32, #tpu.memory_space<vmem>>, vector<1x1x16xi32>,
    return
  }
  func.func @transform_0(%arg0: i32, %arg1: i32) -> (i32, i32) {
    %c0_i32 = arith.constant 0 : i32
    %c0_i32_0 = arith.constant 0 : i32
    return %arg0, %c0_i32 : i32, i32
  }
  func.func @transform_1(%arg0: i32, %arg1: i32) -> (i32, i32, i32) {
    %c0_i32 = arith.constant 0 : i32
    %c0_i32_0 = arith.constant 0 : i32
    %c0_i32_1 = arith.constant 0 : i32
    return %arg1, %c0_i32, %c0_i32_0 : i32, i32, i32
  }
  func.func @transform_2(%arg0: i32, %arg1: i32) -> (i32, i32, i32) {
    %c0_i32 = arith.constant 0 : i32
    %c0_i32_0 = arith.constant 0 : i32
    %c0_i32_1 = arith.constant 0 : i32
    return %arg1, %c0_i32, %c0_i32_0 : i32, i32, i32
  }
  func.func @transform_3(%arg0: i32, %arg1: i32) -> (i32, i32) {
    %c0_i32 = arith.constant 0 : i32
    %c0_i32_0 = arith.constant 0 : i32
    return %arg0, %c0_i32 : i32, i32
  }
  func.func @transform_4(%arg0: i32, %arg1: i32) -> (i32, i32, i32) {
    %c0_i32 = arith.constant 0 : i32
    %c0_i32_0 = arith.constant 0 : i32
    %c0_i32_1 = arith.constant 0 : i32
    return %arg0, %c0_i32, %c0_i32_0 : i32, i32, i32
  }
  func.func @transform_5(%arg0: i32, %arg1: i32) -> (i32, i32, i32) {
    %c0_i32 = arith.constant 0 : i32
    %c0_i32_0 = arith.constant 0 : i32
    %c0_i32_1 = arith.constant 0 : i32
    return %arg0, %c0_i32, %c0_i32_0 : i32, i32, i32
  }
}

</mosaic_0001>

<bundles_post_ra>
// kernel: tpu_custom_call.1
= control target key start
LH: loop header
LB: loop body
LE: loop exit
PB: predicated region body
PF: predicated region fallthrough
CT: control target
= control target key end

     0   :  { %11 = vsyncpa [#allocation3], 0  ;;  %s1357_s0 = inlined_call_operand.hbm [shape: f32[16,32], index: 0, kind: input, shape index: {}]   ;;  %s1358_s1 = inlined_call_operand.hbm [shape: f32[3,16,32], index: 1, kind: input, shape index: {}]   ;;  %s1359_s2 = inlined_call_operand.vmem [shape: f32[3,1,16], index: 2, kind: input, shape index: {}]   ;;  %s1360_s3 = inlined_call_operand.hbm [shape: f32[16,32], index: 3, kind: output, shape index: {0}]   ;;  %s1361_s4 = inlined_call_operand.vmem [shape: s32[1,3,16], index: 4, kind: output, shape index: {1}]   ;;  %s1362_s5 = inlined_call_operand.hbm [shape: f32[1,1,1], index: 5, kind: output, shape index: {2}]  }
   0x1   :  { %12 = vsyncpa [#allocation6], 0 }
   0x2   :  { %14 = vsyncpa [#allocation6 + $0x1], 0 }
   0x3   :  { %15 = vsyncpa [#allocation4], 0 }
   0x4   :  { %16 = vsyncpa [#allocation9], 0  ;;  %s1112_s18 = smov 0   ;;  %s1114_s19 = smov 0  }
   0x5   :  { %s1116_s20 = smov 0   ;;  %s1118_s21 = smov 0  }
   0x6   :  { %s1120_s22 = smov 0   ;;  %s1122_s23 = smov 0  }
   0x7 LB: > { %s750_s24 = sadd.s32 4294967295, %s1070_s23   ;;  %p80_p0 = scmp.ne.s32.totalorder %s1054_s19, %s1050_s18  ;;  %s1070_s23 = sphi %s1122_s23, %s22_s23   ;;  %s1066_s22 = sphi %s1120_s22, %s1380_s22   ;;  %s1062_s21 = sphi %s1118_s21, %s1379_s21   ;;  %s1058_s20 = sphi %s1116_s20, %s1378_s20   ;;  %s1054_s19 = sphi %s1114_s19, %s1377_s19   ;;  %s1050_s18 = sphi %s1112_s18, %s1376_s18  }
   0x8   : > { %p1144_p1 = scmp.eq.s32.totalorder %s750_s24, 0  ;;  %p751_p2 = scmp.ge.s32.totalorder %s1070_s23, 1 }
   0x9   : > { %p195_p3 = scmp.lt.s32.totalorder %s1070_s23, 4  ;;  %s1072_s28 = smov [#allocation2]  }
   0xa   : > { %s1367_s25 = scalar_select %p1144_p1, 1, 0 }
   0xb   : > { %p1152_p4 = por %p1144_p1, %p80_p0  ;;  %p1156_p5 = pnand %p751_p2, %p195_p3 }
   0xc   : > { %s210_s29 = sshll.u32 %s1072_s28, 4  ;;  %s31_s6 = sadd.s32 1, %s1066_s22  ;;  %s211_s29 = int_to_ptr.vmem [resolvable:$true] %s210_s29 }
   0xd   : > { %s1368_s26 = scalar_select %p1152_p4, 1, 0 }
   0xe   : > { %s1369_s27 = scalar_select %p1156_p5, 1, 0 }
   0xf   : > { %p826_p6 = pneg %p1156_p5  ;;  %s898_s9 = scalar_lea.hbm %s1357_s0, 256 }
  0x10   : > { %p899_p8 = scmp.ne.s32.totalorder %s1357_s0, %s898_s9  ;;  %p905_p12 = scmp.lt.u32.totalorder %s898_s9, %s1357_s0 }
  0x11   : > { %p1164_p7 = pnand %p826_p6, %p1144_p1 }
  0x13   : > { %p900_p9 = pneg %p1164_p7 }
  0x15   : > { %p901_p10 = pnand %p900_p9, %p899_p8 }
  0x17   : > { %p902_p11 = pneg %p901_p10 }
  0x19   : > { %p907_p13 = pnand %p905_p12, %p902_p11 }
  0x1b   : > { %910 = shalt.err (!%p907_p13)
}
  0x1c   : > { %s911_s14 = scalar_lea.vmem %s211_s29, 256  ;;  %p919_p6 = scmp.lt.s32.totalorder %s211_s29, %s211_s29 }
  0x1d   : > { %p912_p0 = scmp.ne.s32.totalorder %s211_s29, %s911_s14  ;;  %p920_p4 = scmp.lt.s32.totalorder %s911_s14, %s911_s14 }
  0x1f   : > { %p914_p2 = pnand %p912_p0, %p900_p9  ;;  %p921_p1 = por %p920_p4, %p919_p6 }
  0x21   : > { %p915_p3 = pneg %p914_p2 }
  0x23   : > { %p922_p5 = pnand %p921_p1, %p915_p3 }
  0x25   : > { %925 = shalt.err (!%p922_p5)
}
  0x26   : > { %s1073_s15 = smov 128   ;;  %s1074_s16 = smov 8  }
  0x27   : > { %829 = dma.hbm_to_vmem [thread:$0]  (!%p1164_p7), %s1357_s0, 256, %s211_s29, [#allocation3], %s1073_s15, %s1073_s15, %s1074_s16  }
  0x28   : > { %p32_p1 = scmp.ge.s32.totalorder %s31_s6, 3  ;;  %s67_s28 = sadd.s32 1, %s1058_s20 }
  0x29   : > { %p74_p4 = scmp.ne.s32.totalorder %s1058_s20, %s1054_s19  ;;  %p75_p5 = scmp.eq.s32.totalorder %s1070_s23, 0 }
  0x2a   : > { %s1382_s6 = smov (%p32_p1, %s31_s6), 0  ;;  %p835_p9 = scmp.lt.s32.totalorder %s1070_s23, 3 }
  0x2b   : > { %p76_p8 = por %p75_p5, %p74_p4  ;;  %s64_s7 = ssub.s32 %s1066_s22, %s1382_s6 }
  0x2c   : > { %s224_s8 = sand.u32 1, %s1058_s20   ;;  %p65_p10 = scmp.eq.s32.totalorder %s64_s7, 0 }
  0x2d   : > { %s754_s30 = sshll.u32 %s224_s8, 4  ;;  %s777_s9 = sshll.u32 %s1066_s22, 8 }
  0x2e   : > { %s1200_s10 = scalar_select %p65_p10, %s1058_s20, %s67_s28  }
  0x2f   : > { %s1205_s29 = scalar_lea.hbm %s1358_s1, %s777_s9  ;;  %s228_s13 = scalar_lea.vmem [#allocation5], %s754_s30 }
  0x30   : > { %s235_s14 = sshll.u32 %s228_s13, 4  ;;  %p1207_p7 = pnand %p835_p9, %p76_p8  ;;  %s1211_s14 = int_to_ptr.vmem [resolvable:$true] %s235_s14 }
  0x31   : > { %s1213_s18 = scalar_lea.sflag [#allocation6], %s224_s8  ;;  %s926_s28 = scalar_lea.hbm %s1205_s29, 256 }
  0x32   : > { %p927_p11 = scmp.ne.s32.totalorder %s1205_s29, %s926_s28  ;;  %p928_p12 = pneg %p1207_p7 }
  0x33   : > { %s931_s9 = scalar_lea.hbm %s1358_s1, 768  ;;  %p932_p2 = scmp.lt.u32.totalorder %s1205_s29, %s1358_s1 }
  0x34   : > { %p929_p13 = pnand %p928_p12, %p927_p11  ;;  %p933_p3 = scmp.lt.u32.totalorder %s931_s9, %s926_s28 }
  0x35   : > { %p935_p1 = scmp.lt.u32.totalorder %s926_s28, %s1205_s29 }
  0x36   : > { %p930_p0 = pneg %p929_p13  ;;  %p934_p6 = por %p933_p3, %p932_p2 }
  0x38   : > { %p936_p4 = por %p935_p1, %p934_p6 }
  0x3a   : > { %p937_p5 = pnand %p936_p4, %p930_p0 }
  0x3c   : > { %940 = shalt.err (!%p937_p5)
}
  0x3d   : > { %s941_s8 = scalar_lea.vmem %s1211_s14, 256  ;;  %s1075_s13 = smov [#allocation5]  }
  0x3e   : > { %p942_p8 = scmp.ne.s32.totalorder %s1211_s14, %s941_s8  ;;  %s946_s7 = sshll.u32 %s1075_s13, 4  ;;  %s947_s7 = int_to_ptr.vmem [resolvable:$false] %s946_s7 }
  0x3f   : > { %s948_s30 = scalar_lea.vmem %s947_s7, 512  ;;  %p949_p11 = scmp.lt.s32.totalorder %s1211_s14, %s947_s7 }
  0x40   : > { %p944_p9 = pnand %p942_p8, %p928_p12  ;;  %p950_p13 = scmp.lt.s32.totalorder %s948_s30, %s941_s8 }
  0x42   : > { %p945_p10 = pneg %p944_p9  ;;  %p951_p2 = por %p950_p13, %p949_p11 }
  0x44   : > { %p952_p3 = pnand %p951_p2, %p945_p10 }
  0x46   : > { %955 = shalt.err (!%p952_p3)
}
  0x47   : > { %833 = dma.hbm_to_vmem [thread:$0]  (!%p1207_p7), %s1205_s29, 256, %s1211_s14, %s1213_s18, %s1073_s15, %s1073_s15, %s1074_s16  }
  0x48   : > { %p1372_p12 = scmp.ne.s32.totalorder %s1369_s27, 0 }
  0x49   : > { %p1373_p0 = scmp.ne.s32.totalorder (!%p1372_p12), %s1367_s25, 0 }
  0x4a   : > { %253 = sbr.rel (%p1372_p12) target bundleno = 1214 (0x4be), region = 32 }
  0x51   : > { %1033 = dma.done.wait (%p1373_p0), [#allocation3], 256  }
  0x52   : > { %1035 = vsyncadd (%p1373_p0), [#allocation3], 4294967040  ;;  %s259_s28 = sand.u32 1, %s1054_s19   ;;  %p1374_p6 = scmp.ne.s32.totalorder %s1368_s26, 0 }
  0x53   : > { %s759_s17 = sshll.u32 %s259_s28, 4  ;;  %s260_s9 = scalar_lea.sflag [#allocation6], %s259_s28 }
  0x54   : > { %s263_s11 = scalar_lea.vmem [#allocation5], %s759_s17 }
  0x55   : > { %1037 = dma.done.wait (%p1374_p6), %s260_s9, 256  }
  0x56   : > { %1039 = vsyncadd (%p1374_p6), %s260_s9, 4294967040  ;;  %p293_p7 = scmp.lt.s32.totalorder %s1062_s21, 2  ;;  %p760_p1 = scmp.ne.s32.totalorder %s1062_s21, 0 }
  0x57   : > { %v305_v0 = vld [vmem:[#allocation2] sm:$0xff] (!%p760_p1)  ;;  %vm307_vm0 = vcmask (!%p760_p1), 261120   ;;  %v306_v1 = vld [vmem:[#allocation2 + $0x8] sm:$0xff] (!%p760_p1)  ;;  %vm310_vm1 = vcmask (!%p760_p1), 0   ;;  %v1076_v2 = vmov (!%p760_p1), 0.0  }
  0x58   : > { %s294_s27 = scalar_select %p293_p7, %s1062_s21, 2 }
  0x59   : > { %304 = sbr.rel (%p760_p1) target bundleno = 96 (0x60), region = 44  ;;  %308 = vst.msk [vmem:[#allocation7] sm:$0xff] (!%p760_p1), %vm307_vm0, %v305_v0  ;;  %309 = vst.msk [vmem:[#allocation7 + $0x8] sm:$0xff] (!%p760_p1), %vm307_vm0, %v306_v1 }
  0x5a   : > { %s295_s25 = scalar_lea.vmem %s1359_s2, %s294_s27  ;;  %311 = vst.msk [vmem:[#allocation8] sm:$0x1] (!%p760_p1), %vm310_vm1, %v1076_v2 }
  0x60 PF: > { %v314_v3 = vld [vmem:[%s263_s11] sm:$0xff]  ;;  %v315_v4 = vld [vmem:[%s263_s11 + $0x8] sm:$0xff]  ;;  %vm317_vm2 = vcmask 261120   ;;  %vm415_vm4 = vcmask 130048   ;;  %v422_v17 = vlaneseq  ;;  %v1077_v50 = vmov 0.0   ;;  %s596_s14 = scalar_lea.vmem %s1361_s4, %s1062_s21  ;;  %p1291_p4 = scmp.eq.s32.totalorder %s750_s24, 2 }
  0x61   : > { %v1261_v5 = vld [vmem:[#allocation7] sm:$0xff]  ;;  %v800_v6 = vpack.c.bf16 %v315_v4, %v314_v3  ;;  %vm801_vm3 = vmpackc.low %vm317_vm2, %vm317_vm2  ;;  %v1267_v7 = vld [vmem:[#allocation7 + $0x8] sm:$0xff]  ;;  %vm594_vm10 = vcmask 130112   ;;  %vm597_vm11 = vcmask 122880   ;;  %s1078_s18 = smov [#allocation7]  }
  0x62   : > { %790 = vmatprep.mubr.msk.f32.mxu0 %vm317_vm2, %v1261_v5  ;;  %v765_v10 = vld [vmem:[%s295_s25] ss:$0 sm:$0xff]  ;;  %v423_v18 = vand.u32 127, %v422_v17  ;;  %v586_v38 = vshrl.u32 %v422_v17, 7  ;;  %s612_s12 = sshll.u32 %s1078_s18, 4  ;;  %s613_s12 = int_to_ptr.vmem [resolvable:$true] %s612_s12 }
  0x63   : > { %802 = vmatprep.subr.msk.bf16.mxu0 %vm801_vm3, %v800_v6  ;;  %807 = vmatprep.subr.bf16.mxu1 %v800_v6  ;;  %s956_s8 = scalar_lea.vmem %s613_s12, 256  ;;  %p963_p10 = scmp.lt.s32.totalorder %s613_s12, %s613_s12 }
  0x64   : > { %805 = vmatpush3.bf16.xpose.msk.msra.mxu0 %vm801_vm3, %v800_v6  ;;  %809 = vmatpush3.bf16.msra.mxu1 %v800_v6  ;;  %v589_v43 = vadd.s32 4294967288, %v423_v18  ;;  %v587_v45 = vsub.s32 %v423_v18, %v586_v38  ;;  %p957_p5 = scmp.ne.s32.totalorder %s613_s12, %s956_s8  ;;  %p964_p11 = scmp.lt.s32.totalorder %s956_s8, %s956_s8 }
  0x66   : > { %v592_v48 = vsub.s32 %v589_v43, %v586_v38  ;;  %p958_p8 = pnand %p957_p5, %p1291_p4  ;;  %p965_p13 = por %p964_p11, %p963_p10 }
  0x68   : > { %p959_p9 = pneg %p958_p8 }
  0x6a   : > { %p966_p2 = pnand %p965_p13, %p959_p9 }
  0x6b   : > { %791 = vmatmul.mubr.msk.f32.vlgmr.msra.gmra.mrb[0].mxu0 %vm317_vm2, %v1267_v7 }
 0x13e   : > { %v792_v8 = vpop.f32.mrb[0].mxu0 }
 0x13f   : > { %v396_v9 = vpop.f32.mrb[1].mxu0  ;;  %v406_v11 = vmul.f32 2.0, %v792_v8 }
 0x140   : > { %v405_v12 = vmul.f32 2.0, %v396_v9 }
 0x141   : > { %v414_v15 = vsub.f32 %v765_v10, %v406_v11 }
 0x142   : > { %v413_v13 = vsub.f32 %v765_v10, %v405_v12 }
 0x143   : > { %v419_v16 = vsel %vm415_vm4, %v414_v15, inf }
 0x144   : > { %v416_v14 = vsel %vm415_vm4, %v413_v13, inf }
 0x145   : > { %417 = vmin.xlane.f32.xlu0 %v416_v14 }
 0x149   : > { %420 = vmin.xlane.f32.xlu0 %v419_v16 }
 0x1d2   : > { %v418_v19 = vpop.xlane.xlu0 %417 }
 0x1d3   : > { %vm424_vm5 = vcmp.eq.f32.partialorder %v413_v13, %v418_v19 }
 0x1d4   : > { %v426_v20 = vsel %vm424_vm5, %v423_v18, 16 }
 0x1d5   : > { %v428_v21 = vsel %vm415_vm4, %v426_v20, 2147483647 }
 0x1d6   : > { %v421_v22 = vpop.xlane.xlu0 %420  ;;  %v430_v23 = vshra.s32 %v428_v21, 16  ;;  %v429_v29 = vand.u32 65535, %v428_v21 }
 0x1d7   : > { %vm425_vm6 = vcmp.eq.f32.partialorder %v414_v15, %v421_v22 }
 0x1d8   : > { %v427_v24 = vsel %vm425_vm6, %v423_v18, 16  ;;  %v432_v25 = vcvt.s32.f32 %v430_v23  ;;  %v431_v31 = vcvt.s32.f32 %v429_v29 }
 0x1d9   : > { %v443_v26 = vsel %vm415_vm4, %v427_v24, 2147483647 }
 0x1da   : > { %433 = vmin.xlane.f32.xlu1 %v432_v25  ;;  %v445_v27 = vshra.s32 %v443_v26, 16  ;;  %v444_v32 = vand.u32 65535, %v443_v26 }
 0x1dc   : > { %v447_v28 = vcvt.s32.f32 %v445_v27  ;;  %v446_v35 = vcvt.s32.f32 %v444_v32 }
 0x1de   : > { %448 = vmin.xlane.f32.xlu1 %v447_v28 }
 0x267   : > { %v434_v30 = vpop.xlane.xlu1 %433 }
 0x268   : > { %vm435_vm7 = vcmp.eq.f32.partialorder %v432_v25, %v434_v30  ;;  %v440_v37 = vcvt.f32.s32 %v434_v30 }
 0x269   : > { %v436_v33 = vsel %vm435_vm7, %v431_v31, inf }
 0x26a   : > { %437 = vmin.xlane.f32.xlu0 %v436_v33  ;;  %v441_v40 = vshll.u32 %v440_v37, 16 }
 0x26b   : > { %v449_v34 = vpop.xlane.xlu1 %448 }
 0x26c   : > { %vm450_vm8 = vcmp.eq.f32.partialorder %v447_v28, %v449_v34  ;;  %v455_v41 = vcvt.f32.s32 %v449_v34 }
 0x26d   : > { %v451_v36 = vsel %vm450_vm8, %v446_v35, inf }
 0x26e   : > { %452 = vmin.xlane.f32.xlu1 %v451_v36  ;;  %v456_v47 = vshll.u32 %v455_v41, 16 }
 0x2f7   : > { %v438_v39 = vpop.xlane.xlu0 %437 }
 0x2f8   : > { %v439_v42 = vcvt.f32.s32 %v438_v39 }
 0x2fa   : > { %v442_v44 = vadd.s32 %v441_v40, %v439_v42 }
 0x2fb   : > { %v453_v46 = vpop.xlane.xlu1 %452 }
 0x2fc   : > { %v454_v49 = vcvt.f32.s32 %v453_v46  ;;  %vm458_vm9 = vcmp.eq.s32.totalorder %v442_v44, %v423_v18  ;;  %v588_v53 = vrot.slane %v442_v44, %v587_v45 }
 0x2fd   : > { %v766_v51 = vsel %vm458_vm9, 1.0, %v1077_v50 }
 0x2fe   : > { %v457_v52 = vadd.s32 %v456_v47, %v454_v49  ;;  %797 = vmatprep.mubr.msk.f32.mxu1 %vm415_vm4, %v766_v51 }
 0x300   : > { %v593_v54 = vrot.slane %v457_v52, %v592_v48  ;;  %vm459_vm12 = vcmp.eq.s32.totalorder %v457_v52, %v423_v18 }
 0x301   : > { %v767_v55 = vsel %vm459_vm12, 1.0, %v1077_v50 }
 0x302   : > { %v595_v56 = vsel %vm594_vm10, %v593_v54, %v588_v53  ;;  %798 = vmatmul.mubr.msk.f32.vlgmr.msra.gmra.mrb[0].mxu1 %vm415_vm4, %v767_v55 }
 0x303   : > { %598 = vst.msk [vmem:[%s596_s14] sm:$0x1] %vm597_vm11, %v595_v56 }
 0x3d5   : > { %v799_v57 = vpop.f32.mrb[0].mxu1 }
 0x3d6   : > { %v559_v58 = vsub.f32 %v799_v57, %v1267_v7  ;;  %v582_v59 = vsub.f32 %v1267_v7, %v799_v57  ;;  %v536_v60 = vpop.f32.mrb[1].mxu1 }
 0x3d7   : > { %v558_v61 = vsub.f32 %v536_v60, %v1261_v5  ;;  %v581_v62 = vsub.f32 %v1261_v5, %v536_v60 }
 0x3d8   : > { %v564_v63 = vmul.f32 %v559_v58, %v559_v58  ;;  %584 = vst.msk [vmem:[#allocation7 + $0x8] sm:$0xff] %vm317_vm2, %v582_v59 }
 0x3d9   : > { %v563_v0 = vmul.f32 %v558_v61, %v558_v61  ;;  %583 = vst.msk [vmem:[#allocation7] sm:$0xff] %vm317_vm2, %v581_v62 }
 0x3da   : > { %v566_v1 = vsel %vm317_vm2, %v564_v63, 0.0 }
 0x3db   : > { %v565_v2 = vsel %vm317_vm2, %v563_v0, 0.0 }
 0x3dc   : > { %v567_v3 = vadd.f32 %v566_v1, %v565_v2 }
 0x3de   : > { %568 = vadd.xlane.f32.xlu0 %v567_v3 }
 0x3df   : > { %969 = shalt.err (!%p966_p2)
}
 0x3e0   : > { %s970_s24 = scalar_lea.hbm %s1360_s3, 256 }
 0x3e1   : > { %p971_p3 = scmp.ne.s32.totalorder %s1360_s3, %s970_s24  ;;  %p976_p6 = scmp.lt.u32.totalorder %s970_s24, %s1360_s3 }
 0x3e3   : > { %p972_p12 = pnand %p971_p3, %p1291_p4 }
 0x3e5   : > { %p973_p0 = pneg %p972_p12 }
 0x3e7   : > { %p978_p7 = pnand %p976_p6, %p973_p0 }
 0x3e9   : > { %981 = shalt.err (!%p978_p7)
}
 0x3ea   : > { %s1079_s11 = smov 128   ;;  %s1080_s27 = smov 8   ;;  %v562_v11 = vld [vmem:[#allocation8] sm:$0x1]  ;;  %vm579_vm13 = vcmask 0  }
 0x3eb   : > { %819 = dma.vmem_to_hbm [thread:$0]  (%p1291_p4), %s613_s12, 256, %s1360_s3, [#allocation4], %s1079_s11, %s1079_s11, %s1080_s27  }
 0x3ec   : > { %s1081_s25 = smov [#allocation8]  }
 0x3ed   : > { %s631_s26 = sshll.u32 %s1081_s25, 4  ;;  %s632_s26 = int_to_ptr.vmem [resolvable:$true] %s631_s26 }
 0x3ee   : > { %s982_s14 = scalar_lea.vmem %s632_s26, 16  ;;  %s988_s18 = scalar_lea.vmem %s632_s26, 32 }
 0x3ef   : > { %p983_p1 = scmp.ne.s32.totalorder %s632_s26, %s982_s14  ;;  %p989_p9 = scmp.lt.s32.totalorder %s632_s26, %s632_s26 }
 0x3f0   : > { %p990_p10 = scmp.lt.s32.totalorder %s988_s18, %s982_s14 }
 0x3f1   : > { %p984_p5 = pnand %p983_p1, %p1291_p4 }
 0x3f2   : > { %p991_p11 = por %p990_p10, %p989_p9 }
 0x3f3   : > { %p985_p8 = pneg %p984_p5 }
 0x3f5   : > { %p992_p13 = pnand %p991_p11, %p985_p8 }
 0x46b   : > { %v569_v4 = vpop.xlane.xlu0 %568 }
 0x46c   : > { %v570_v5 = vrot.slane %v569_v4, 4 }
 0x46e   : > { %v571_v6 = vadd.f32 %v570_v5, %v569_v4 }
 0x470   : > { %v572_v7 = vrot.slane %v571_v6, 2 }
 0x472   : > { %v573_v8 = vadd.f32 %v572_v7, %v571_v6 }
 0x474   : > { %v574_v9 = vrot.slane %v573_v8, 1 }
 0x476   : > { %v575_v10 = vadd.f32 %v574_v9, %v573_v8 }
 0x478   : > { %810 = vpush %v575_v10 }
 0x4a9   : > { %s811_s29 = spop %810 }
 0x4aa   : > { %v577_v12 = vstv %s811_s29 }
 0x4ab   : > { %v578_v13 = vadd.f32 %v577_v12, %v562_v11 }
 0x4ad   : > { %580 = vst.msk [vmem:[#allocation8] sm:$0x1] %vm579_vm13, %v578_v13 }
 0x4ae   : > { %995 = shalt.err (!%p992_p13)
}
 0x4af   : > { %s996_s13 = scalar_lea.hbm %s1362_s5, 16 }
 0x4b0   : > { %p997_p2 = scmp.ne.s32.totalorder %s1362_s5, %s996_s13  ;;  %p1002_p0 = scmp.lt.u32.totalorder %s996_s13, %s1362_s5 }
 0x4b2   : > { %p998_p3 = pnand %p997_p2, %p1291_p4 }
 0x4b4   : > { %p999_p12 = pneg %p998_p3 }
 0x4b6   : > { %p1004_p6 = pnand %p1002_p0, %p999_p12 }
 0x4b8   : > { %1007 = shalt.err (!%p1004_p6)
}
 0x4b9   : > { %821 = dma.vmem_to_hbm [thread:$0]  (%p1291_p4), %s632_s26, 16, %s1362_s5, [#allocation9]  }
 0x4ba   : > { %1041 = dma.done.wait (%p1291_p4), [#allocation4], 256  }
 0x4bb   : > { %1043 = vsyncadd (%p1291_p4), [#allocation4], 4294967040 }
 0x4bc   : > { %1045 = dma.done.wait (%p1291_p4), [#allocation9], 16  }
 0x4bd   : > { %1047 = vsyncadd (%p1291_p4), [#allocation9], 4294967280 }
 0x4be PF: > { %s22_s23 = sadd.s32 1, %s1070_s23   ;;  %s1376_s18 = smov %s1054_s19 }
 0x4bf   : > { %p19_p7 = scmp.ge.s32.totalorder %s22_s23, 5   ;;  %s1377_s19 = smov %s1058_s20 }
 0x4c0   : > { %s1378_s20 = smov %s1200_s10  ;;  %s1379_s21 = smov %s1066_s22 }
 0x4c1   : > { %s1380_s22 = smov %s1382_s6  ;;  %21 = sbr.rel (!%p19_p7) target bundleno = 7 (0x7), region = 105 }
 0x4c8   :  { %655 = vsyncpa [#allocation3], 1 }
 0x4c9   :  { %657 = vsyncpa [#allocation3 + $0x1], 1 }
 0x4ca   :  { %658 = vsyncpa [#allocation6], 1 }
 0x4cb   :  { %660 = vsyncpa [#allocation6 + $0x1], 1 }
 0x4cc   :  { %661 = vsyncpa [#allocation4], 1 }
 0x4cd   :  { %663 = vsyncpa [#allocation4 + $0x1], 1 }
 0x4ce   :  { %664 = vsyncpa [#allocation9], 1 }

</bundles_post_ra>
